<compile_context>
chip_gen: v7x
topology: tpu7x:2x2x1
jax: 0.10.0
libtpu: 0.0.40
codegen_flags: <defaults>
</compile_context>

<pallas_src>
import jax
import jax.numpy as jnp
import numpy as np
from jax.experimental import pallas as pl
from jax.experimental.pallas import tpu as pltpu


def _rope_kernel(inv_ref, x_ref, o_ref, cos_sc, sin_sc):
    # Grid: (num_seq_tiles, B) — batch is the innermost ("arbitrary") axis so
    # the cos/sin half-tables in scratch are reused across the batch sweep.
    s_idx = pl.program_id(0)
    b_idx = pl.program_id(1)
    TS, half = cos_sc.shape

    @pl.when(b_idx == 0)
    def _():
        # t = tile_start + iota (offset required because S is tiled)
        pos = (jax.lax.broadcasted_iota(jnp.int32, (TS, half), 0)
               + s_idx * TS).astype(jnp.float32)
        freqs = pos * inv_ref[...]            # (TS, half) * (1, half) -> (TS, half)
        cos_sc[...] = jnp.cos(freqs)
        sin_sc[...] = jnp.sin(freqs)

    x = x_ref[0].astype(jnp.float32)          # (TS, D), f32 math (v5e-safe)
    x1 = x[:, :half]
    x2 = x[:, half:]
    c = cos_sc[...]
    s = sin_sc[...]
    # emb = cat(freqs, freqs); rotate_half(x) = cat(-x2, x1)
    #   out[..., :half] = x1*cos - x2*sin
    #   out[..., half:] = x2*cos + x1*sin
    lo = x1 * c - x2 * s
    hi = x2 * c + x1 * s
    # Single full-width store of the (TS, D) tile (lane-dense output slab).
    o_ref[0] = jnp.concatenate([lo, hi], axis=-1).astype(o_ref.dtype)


def _choose_seq_tile(S, D, itemsize):
    if S <= 1024:
        return S
    # ~2 MiB blocks: double-buffered in + out stays well under scoped VMEM on
    # all chips while keeping per-step overhead amortized.
    target_bytes = 2 * 1024 * 1024
    ts = max(8, target_bytes // max(D * itemsize, 1))
    ts = min(ts, S)
    return max(8, (ts // 8) * 8)


def rotary_positional_encoding(x, inv_freq):
    """x: (B, S, D), inv_freq: (D//2,) -> (B, S, D). D must be even."""
    B, S, D = x.shape
    half = D // 2
    TS = _choose_seq_tile(S, D, jnp.dtype(x.dtype).itemsize)
    inv2d = inv_freq.reshape(1, half).astype(jnp.float32)

    # NOTE: best store efficiency requires D % 128 == 0 (lane-dense output);
    # the toy D=32 case uses masked stores but remains correct.
    return pl.pallas_call(
        _rope_kernel,
        out_shape=jax.ShapeDtypeStruct((B, S, D), x.dtype),
        grid_spec=pltpu.PrefetchScalarGridSpec(
            num_scalar_prefetch=0,
            grid=(pl.cdiv(S, TS), B),
            in_specs=[
                pl.BlockSpec((1, half), lambda s, b: (0, 0)),      # inv_freq (replicated)
                pl.BlockSpec((1, TS, D), lambda s, b: (b, s, 0)),  # x seq-tile per batch
            ],
            out_specs=pl.BlockSpec((1, TS, D), lambda s, b: (b, s, 0)),
            scratch_shapes=[
                pltpu.VMEM((TS, half), jnp.float32),   # cos half-table
                pltpu.VMEM((TS, half), jnp.float32),   # sin half-table
            ],
        ),
        compiler_params=pltpu.CompilerParams(
            # seq-tile axis can be split across TCs (v7x megacore); batch axis
            # carries the cos/sin scratch so it must be "arbitrary".
            dimension_semantics=("parallel", "arbitrary")),
    )(inv2d, x)


def _reference_rope(x, inv_freq):
    # Pure-JAX reference mirroring the PyTorch module exactly.
    S = x.shape[1]
    D = x.shape[2]
    t = jnp.arange(S, dtype=inv_freq.dtype)
    freqs = jnp.einsum("i,j->ij", t, inv_freq)
    emb = jnp.concatenate([freqs, freqs], axis=-1)
    x1, x2 = x[..., : D // 2], x[..., D // 2:]
    x_rot = jnp.concatenate([-x2, x1], axis=-1)
    return x * jnp.cos(emb) + x_rot * jnp.sin(emb)


if __name__ == "__main__":
    # Small shapes consistent with the module: batch=2, seq=8, d_model=32.
    B, S, D = 2, 8, 32

    key = jax.random.PRNGKey(0)
    x = jax.random.normal(key, (B, S, D), dtype=jnp.float32)

    # __init__: inv_freq = 1 / 10000 ** (arange(0, d_model, 2) / d_model)
    inv_freq = 1.0 / (10000.0 ** (jnp.arange(0, D, 2, dtype=jnp.float32) / D))

    out = rotary_positional_encoding(x, inv_freq)
    out = jax.block_until_ready(out)

    ref = jax.block_until_ready(_reference_rope(x, inv_freq))
    np.testing.assert_allclose(np.asarray(out), np.asarray(ref),
                               rtol=1e-5, atol=1e-5)

    print("KERNEL_OK")
</pallas_src>

<mosaic_0001>
module attributes {stable_mosaic.version = 11 : i64} {
  func.func @_rope_kernel(%arg0: i32, %arg1: i32, %arg2: memref<1x16xf32, #tpu.memory_space<vmem>>, %arg3: memref<1x8x32xf32, #tpu.memory_space<vmem>>, %arg4: memref<1x8x32xf32, #tpu.memory_space<vmem>>, %arg5: memref<8x16xf32, #tpu.memory_space<vmem>>, %arg6: memref<8x16xf32, #tpu.memory_space<vmem>>) attributes {dimension_semantics = [#tpu.dimension_semantics<parallel>, #tpu.dimension_semantics<arbitrary>], iteration_bounds = array<i64: 1, 2>, scalar_prefetch = 0 : i64, scratch_operands = 2 : i64, tpu.core_type = #tpu.core_type<tc>, window_params = [{pipeline_mode = #tpu.pipeline_mode<synchronous>, transform_indices = @transform_0, window_bounds = array<i64: 1, 16>}, {transform_indices = @transform_1, window_bounds = array<i64: 1, 8, 32>}, {transform_indices = @transform_2, window_bounds = array<i64: 1, 8, 32>}]} {
    %c0_i32 = arith.constant 0 : i32
    %0 = arith.cmpi eq, %arg1, %c0_i32 : i32
    %1 = arith.extui %0 : i1 to i32
    %c0_i32_0 = arith.constant 0 : i32
    %2 = arith.cmpi ne, %1, %c0_i32_0 : i32
    scf.if %2 {
      %19 = tpu.iota {dimensions = array<i32: 0>} : vector<8x16xi32>
      %c8_i32 = arith.constant 8 : i32
      %20 = arith.muli %arg0, %c8_i32 : i32
      %21 = vector.broadcast %20 : i32 to vector<8x16xi32>
      %22 = arith.addi %19, %21 : vector<8x16xi32>
      %23 = arith.sitofp %22 : vector<8x16xi32> to vector<8x16xf32>
      %c0_10 = arith.constant 0 : index
      %c0_11 = arith.constant 0 : index
      %24 = vector.load %arg2[%c0_10, %c0_11] : memref<1x16xf32, #tpu.memory_space<vmem>>, vector<1x16xf32>
      %25 = vector.broadcast %24 : vector<1x16xf32> to vector<8x16xf32>
      %26 = arith.mulf %23, %25 : vector<8x16xf32>
      %27 = math.cos %26 : vector<8x16xf32>
      %c0_12 = arith.constant 0 : index
      %c0_13 = arith.constant 0 : index
      %28 = vector.load %arg5[%c0_12, %c0_13] : memref<8x16xf32, #tpu.memory_space<vmem>>, vector<8x16xf32>
      tpu.vector_store %arg5[%c0_12, %c0_13], %27 {strides = array<i32>} : memref<8x16xf32, #tpu.memory_space<vmem>>, vector<8x16xf32>,
      %29 = math.sin %26 : vector<8x16xf32>
      %c0_14 = arith.constant 0 : index
      %c0_15 = arith.constant 0 : index
      %30 = vector.load %arg6[%c0_14, %c0_15] : memref<8x16xf32, #tpu.memory_space<vmem>>, vector<8x16xf32>
      tpu.vector_store %arg6[%c0_14, %c0_15], %29 {strides = array<i32>} : memref<8x16xf32, #tpu.memory_space<vmem>>, vector<8x16xf32>,
    } else {
    }
    %c0 = arith.constant 0 : index
    %c0_1 = arith.constant 0 : index
    %c0_2 = arith.constant 0 : index
    %3 = vector.load %arg3[%c0, %c0_1, %c0_2] : memref<1x8x32xf32, #tpu.memory_space<vmem>>, vector<1x8x32xf32>
    %4 = vector.shape_cast %3 : vector<1x8x32xf32> to vector<8x32xf32>
    %5 = vector.extract_strided_slice %4 {offsets = [0, 0], sizes = [8, 16], strides = [1, 1]} : vector<8x32xf32> to vector<8x16xf32>
    %6 = vector.extract_strided_slice %4 {offsets = [0, 16], sizes = [8, 16], strides = [1, 1]} : vector<8x32xf32> to vector<8x16xf32>
    %c0_3 = arith.constant 0 : index
    %c0_4 = arith.constant 0 : index
    %7 = vector.load %arg5[%c0_3, %c0_4] : memref<8x16xf32, #tpu.memory_space<vmem>>, vector<8x16xf32>
    %c0_5 = arith.constant 0 : index
    %c0_6 = arith.constant 0 : index
    %8 = vector.load %arg6[%c0_5, %c0_6] : memref<8x16xf32, #tpu.memory_space<vmem>>, vector<8x16xf32>
    %9 = arith.mulf %5, %7 : vector<8x16xf32>
    %10 = arith.mulf %6, %8 : vector<8x16xf32>
    %11 = arith.subf %9, %10 : vector<8x16xf32>
    %12 = arith.mulf %6, %7 : vector<8x16xf32>
    %13 = arith.mulf %5, %8 : vector<8x16xf32>
    %14 = arith.addf %12, %13 : vector<8x16xf32>
    %15 = tpu.concatenate %11, %14 in 1 : vector<8x16xf32>, vector<8x16xf32> -> vector<8x32xf32>
    %c0_7 = arith.constant 0 : index
    %c0_8 = arith.constant 0 : index
    %c0_9 = arith.constant 0 : index
    %16 = vector.load %arg4[%c0_7, %c0_8, %c0_9] : memref<1x8x32xf32, #tpu.memory_space<vmem>>, vector<1x8x32xf32>
    %17 = vector.shape_cast %16 : vector<1x8x32xf32> to vector<8x32xf32>
    %18 = vector.shape_cast %15 : vector<8x32xf32> to vector<1x8x32xf32>
    tpu.vector_store %arg4[%c0_7, %c0_8, %c0_9], %18 {strides = array<i32>} : memref<1x8x32xf32, #tpu.memory_space<vmem>>, vector<1x8x32xf32>,
    return
  }
  func.func @transform_0(%arg0: i32, %arg1: i32) -> (i32, i32) {
    %c0_i32 = arith.constant 0 : i32
    %c0_i32_0 = arith.constant 0 : i32
    %c0_i32_1 = arith.constant 0 : i32
    return %c0_i32, %c0_i32_0 : i32, i32
  }
  func.func @transform_1(%arg0: i32, %arg1: i32) -> (i32, i32, i32) {
    %c0_i32 = arith.constant 0 : i32
    %c0_i32_0 = arith.constant 0 : i32
    return %arg1, %arg0, %c0_i32 : i32, i32, i32
  }
  func.func @transform_2(%arg0: i32, %arg1: i32) -> (i32, i32, i32) {
    %c0_i32 = arith.constant 0 : i32
    %c0_i32_0 = arith.constant 0 : i32
    return %arg1, %arg0, %c0_i32 : i32, i32, i32
  }
}

</mosaic_0001>

<bundles_post_ra>
// kernel: tpu_custom_call.1
= control target key start
LH: loop header
LB: loop body
LE: loop exit
PB: predicated region body
PF: predicated region fallthrough
CT: control target
= control target key end

     0   :  { %7 = vsyncpa [#allocation5], 0  ;;  %s1084_s0 = inlined_call_operand.hbm [shape: f32[1,16], index: 0, kind: input, shape index: {}]   ;;  %s1085_s1 = inlined_call_operand.hbm [shape: f32[2,8,32], index: 1, kind: input, shape index: {}]   ;;  %s1086_s2 = inlined_call_operand.hbm [shape: f32[2,8,32], index: 2, kind: output, shape index: {}]  }
   0x1   :  { %8 = vsyncpa [#allocation8], 0 }
   0x2   :  { %10 = vsyncpa [#allocation8 + $0x1], 0 }
   0x3   :  { %11 = vsyncpa [#allocation6], 0 }
   0x4   :  { %13 = vsyncpa [#allocation6 + $0x1], 0  ;;  %s839_s9 = smov 0   ;;  %s841_s10 = smov 0  }
   0x5   :  { %s843_s11 = smov 0   ;;  %s845_s12 = smov 0  }
   0x6   :  { %s847_s13 = smov 0   ;;  %s849_s14 = smov 0  }
   0x7 LB: > { %s553_s15 = sadd.s32 4294967295, %s811_s14   ;;  %s554_s16 = sadd.s32 4294967294, %s811_s14   ;;  %s811_s14 = sphi %s849_s14, %s19_s14   ;;  %s807_s13 = sphi %s847_s13, %s1111_s13   ;;  %s803_s12 = sphi %s845_s12, %s1110_s12   ;;  %s799_s11 = sphi %s843_s11, %s1109_s11   ;;  %s795_s10 = sphi %s841_s10, %s1108_s10   ;;  %s791_s9 = sphi %s839_s9, %s1107_s9  }
   0x8   : > { %p74_p0 = scmp.ne.s32.totalorder %s795_s10, %s791_s9  ;;  %p873_p1 = scmp.eq.s32.totalorder %s553_s15, 0 }
   0x9   : > { %p877_p2 = scmp.eq.s32.totalorder %s553_s15, 1  ;;  %p106_p3 = scmp.eq.s32.totalorder %s554_s16, 1 }
   0xa   : > { %s1091_s17 = scalar_select %p873_p1, 1, 0 }
   0xb   : > { %s1092_s18 = scalar_select %p877_p2, 1, 0 }
   0xc   : > { %p883_p4 = por %p873_p1, %p74_p0  ;;  %p555_p5 = scmp.ge.s32.totalorder %s811_s14, 1 }
   0xd   : > { %p888_p6 = por %p106_p3, %p74_p0  ;;  %p113_p7 = scmp.lt.s32.totalorder %s811_s14, 3 }
   0xe   : > { %s1093_s19 = scalar_select %p883_p4, 1, 0 }
   0xf   : > { %s1094_s20 = scalar_select %p888_p6, 1, 0 }
  0x10   : > { %p893_p8 = pnand %p555_p5, %p113_p7  ;;  %s813_s22 = smov [#allocation4]  }
  0x11   : > { %s126_s23 = sshll.u32 %s813_s22, 4  ;;  %s28_s25 = sadd.s32 1, %s807_s13  ;;  %s127_s23 = int_to_ptr.vmem [resolvable:$true] %s126_s23 }
  0x12   : > { %s1095_s21 = scalar_select %p893_p8, 1, 0 }
  0x13   : > { %p590_p10 = pneg %p893_p8  ;;  %s61_s26 = sadd.s32 1, %s799_s11 }
  0x14   : > { %p908_p12 = scmp.ge.s32.totalorder %s28_s25, 2  ;;  %s667_s30 = scalar_lea.hbm %s1084_s0, 16 }
  0x15   : > { %p902_p11 = pnand %p590_p10, %p873_p1  ;;  %p668_p13 = scmp.ne.s32.totalorder %s1084_s0, %s667_s30 }
  0x16   : > { %s1097_s27 = scalar_select %p908_p12, 1, 0 }
  0x17   : > { %p669_p0 = pneg %p902_p11  ;;  %p674_p7 = scmp.lt.u32.totalorder %s667_s30, %s1084_s0 }
  0x19   : > { %p670_p3 = pnand %p669_p0, %p668_p13 }
  0x1b   : > { %p671_p5 = pneg %p670_p3 }
  0x1d   : > { %p676_p10 = pnand %p674_p7, %p671_p5 }
  0x1f   : > { %679 = shalt.err (!%p676_p10)
}
  0x20   : > { %s680_s7 = scalar_lea.vmem %s127_s23, 16  ;;  %s687_s8 = scalar_lea.vmem %s127_s23, 32 }
  0x21   : > { %p681_p9 = scmp.ne.s32.totalorder %s127_s23, %s680_s7  ;;  %p688_p1 = scmp.lt.s32.totalorder %s127_s23, %s127_s23 }
  0x22   : > { %p689_p8 = scmp.lt.s32.totalorder %s687_s8, %s680_s7 }
  0x23   : > { %p683_p6 = pnand %p681_p9, %p669_p0 }
  0x24   : > { %p690_p2 = por %p689_p8, %p688_p1 }
  0x25   : > { %p684_p4 = pneg %p683_p6 }
  0x27   : > { %p691_p12 = pnand %p690_p2, %p684_p4 }
  0x29   : > { %694 = shalt.err (!%p691_p12)
}
  0x2a   : > { %593 = dma.hbm_to_vmem [thread:$0]  (!%p902_p11), %s1084_s0, 16, %s127_s23, [#allocation5]  }
  0x2b   : > { %p1098_p1 = scmp.ne.s32.totalorder %s1097_s27, 0  ;;  %p68_p2 = scmp.ne.s32.totalorder %s799_s11, %s795_s10 }
  0x2c   : > { %p69_p4 = scmp.eq.s32.totalorder %s811_s14, 0  ;;  %p603_p6 = scmp.lt.s32.totalorder %s811_s14, 2 }
  0x2d   : > { %s1113_s25 = smov (%p1098_p1, %s28_s25), 0  ;;  %p1099_p12 = scmp.ne.s32.totalorder %s1092_s18, 0 }
  0x2e   : > { %s56_s22 = ssub.s32 %s807_s13, %s1113_s25  ;;  %p70_p9 = por %p69_p4, %p68_p2 }
  0x2f   : > { %p59_p8 = scmp.eq.s32.totalorder %s56_s22, 0  ;;  %p940_p13 = por %p1099_p12, %p68_p2 }
  0x30   : > { %s137_s28 = sand.u32 1, %s799_s11   ;;  %s559_s27 = sshll.u32 %s807_s13, 7 }
  0x31   : > { %s948_s29 = scalar_select %p59_p8, %s799_s11, %s61_s26  }
  0x32   : > { %s558_s23 = sshll.u32 %s137_s28, 3  ;;  %s954_s4 = scalar_lea.hbm %s1085_s1, %s559_s27 }
  0x33   : > { %s141_s18 = scalar_lea.vmem [#allocation7], %s558_s23  ;;  %p958_p11 = pnand %p603_p6, %p70_p9 }
  0x34   : > { %s149_s5 = sshll.u32 %s141_s18, 4  ;;  %s138_s26 = scalar_lea.sflag [#allocation8], %s137_s28  ;;  %s956_s5 = int_to_ptr.vmem [resolvable:$true] %s149_s5 }
  0x35   : > { %s695_s7 = scalar_lea.hbm %s954_s4, 128  ;;  %p697_p3 = pneg %p958_p11 }
  0x36   : > { %p696_p0 = scmp.ne.s32.totalorder %s954_s4, %s695_s7  ;;  %s700_s16 = scalar_lea.hbm %s1085_s1, 256 }
  0x37   : > { %p701_p10 = scmp.lt.u32.totalorder %s954_s4, %s1085_s1  ;;  %p702_p1 = scmp.lt.u32.totalorder %s700_s16, %s695_s7 }
  0x38   : > { %p698_p5 = pnand %p697_p3, %p696_p0  ;;  %p704_p4 = scmp.lt.u32.totalorder %s695_s7, %s954_s4 }
  0x39   : > { %p703_p2 = por %p702_p1, %p701_p10 }
  0x3a   : > { %p699_p7 = pneg %p698_p5 }
  0x3b   : > { %p705_p6 = por %p704_p4, %p703_p2 }
  0x3d   : > { %p706_p8 = pnand %p705_p6, %p699_p7 }
  0x3f   : > { %709 = shalt.err (!%p706_p8)
}
  0x40   : > { %s710_s28 = scalar_lea.vmem %s956_s5, 128  ;;  %s814_s27 = smov [#allocation7]  }
  0x41   : > { %p711_p9 = scmp.ne.s32.totalorder %s956_s5, %s710_s28  ;;  %s715_s30 = sshll.u32 %s814_s27, 4  ;;  %s716_s30 = int_to_ptr.vmem [resolvable:$false] %s715_s30 }
  0x42   : > { %s717_s3 = scalar_lea.vmem %s716_s30, 256  ;;  %p718_p5 = scmp.lt.s32.totalorder %s956_s5, %s716_s30 }
  0x43   : > { %p713_p12 = pnand %p711_p9, %p697_p3  ;;  %p719_p10 = scmp.lt.s32.totalorder %s717_s3, %s710_s28 }
  0x45   : > { %p714_p0 = pneg %p713_p12  ;;  %p720_p1 = por %p719_p10, %p718_p5 }
  0x47   : > { %p721_p2 = pnand %p720_p1, %p714_p0 }
  0x49   : > { %724 = shalt.err (!%p721_p2)
}
  0x4a   : > { %597 = dma.hbm_to_vmem [thread:$0]  (!%p958_p11), %s954_s4, 128, %s956_s5, %s138_s26  }
  0x4b   : > { %p1102_p7 = scmp.ne.s32.totalorder %s1095_s21, 0 }
  0x4c   : > { %p1103_p3 = scmp.ne.s32.totalorder (!%p1102_p7), %s1091_s17, 0 }
  0x4d   : > { %158 = sbr.rel (%p1102_p7) target bundleno = 439 (0x1b7), region = 28 }
  0x54   : > { %778 = dma.done.wait (%p1103_p3), [#allocation5], 16  }
  0x55   : > { %780 = vsyncadd (%p1103_p3), [#allocation5], 4294967280  ;;  %s994_s18 = sand.u32 1, %s795_s10   ;;  %p1104_p11 = scmp.ne.s32.totalorder %s1093_s19, 0 }
  0x56   : > { %s562_s7 = sshll.u32 %s994_s18, 3  ;;  %s165_s6 = scalar_lea.sflag [#allocation8], %s994_s18 }
  0x57   : > { %s998_s8 = scalar_lea.vmem [#allocation7], %s562_s7 }
  0x58   : > { %782 = dma.done.wait (%p1104_p11), %s165_s6, 128  }
  0x59   : > { %784 = vsyncadd (%p1104_p11), %s165_s6, 4294967168  ;;  %s1004_s21 = scalar_lea.vmem [#allocation9], %s562_s7  ;;  %p564_p4 = scmp.ne.s32.totalorder %s803_s12, 0 }
  0x5a   : > { %v193_v0 = vlaneseq (!%p564_p4)  ;;  %v565_v2 = vld [vmem:[#allocation4] ss:$0 sm:$0xff] (!%p564_p4)  ;;  %v815_v16 = vmov (!%p564_p4), 683565275   ;;  %v816_v18 = vmov (!%p564_p4), 2475754826  }
  0x5b   : > { %192 = sbr.rel (%p564_p4) target bundleno = 179 (0xb3), region = 40  ;;  %v817_v20 = vmov (!%p564_p4), 2131351028   ;;  %v818_v22 = vmov (!%p564_p4), 2102212464  }
  0x5c   : > { %v194_v1 = vshrl.u32 (!%p564_p4), %v193_v0, 7  ;;  %v819_v24 = vmov (!%p564_p4), 920167782   ;;  %v820_v31 = vmov (!%p564_p4), 1326507024  }
  0x5e   : > { %v198_v3 = vcvt.s32.f32 (!%p564_p4), %v194_v1 }
  0x60   : > { %v1007_v4 = vmul.f32 (!%p564_p4), %v565_v2, %v198_v3 }
  0x62   : > { %v210_v5 = vand.u32 2139095040, %v1007_v4  ;;  %v207_v7 = vand.u32 2147483647, %v1007_v4  ;;  %vm209_vm7 = vcmp.lt.s32.totalorder %v1007_v4, 0  ;;  %vm299_vm15 = vweird.f32 %v1007_v4 }
  0x64   : > { %v211_v6 = vshrl.u32 %v210_v5, 23  ;;  %v214_v10 = vand.u32 8388607, %v207_v7  ;;  %vm208_vm8 = vcmp.le.f32.partialorder %v207_v7, 0.7853982 }
  0x66   : > { %v566_v8 = vadd.s32 4294967169, %v211_v6  ;;  %v215_v13 = vor.u32 8388608, %v214_v10 }
  0x68   : > { %v217_v9 = vadd.s32 1, %v566_v8  ;;  %v255_v33 = vshll.u32 %v215_v13, 8 }
  0x6a   : > { %vm218_vm0 = vcmp.gt.s32.totalorder %v217_v9, 0 }
  0x6b   : > { %v219_v11 = vsel %vm218_vm0, %v217_v9, 0  ;;  %vm310_vm0 = vcmask 130048  }
  0x6c   : > { %v221_v12 = vand.u32 31, %v219_v11  ;;  %v220_v14 = vshrl.u32 %v219_v11, 5 }
  0x6e   : > { %v222_v15 = vsub.s32 32, %v221_v12  ;;  %v224_v17 = vshll.u32 %v815_v16, %v221_v12  ;;  %v227_v19 = vshll.u32 %v816_v18, %v221_v12  ;;  %v230_v21 = vshll.u32 %v817_v20, %v221_v12 }
  0x6f   : > { %v233_v23 = vshll.u32 %v818_v22, %v221_v12  ;;  %v236_v25 = vshll.u32 %v819_v24, %v221_v12  ;;  %vm239_vm1 = vcmp.lt.s32.totalorder %v220_v14, 1  ;;  %vm242_vm2 = vcmp.lt.s32.totalorder %v220_v14, 4 }
  0x70   : > { %v223_v26 = vshrl.u32 %v815_v16, %v222_v15  ;;  %v225_v27 = vshrl.u32 %v816_v18, %v222_v15  ;;  %v228_v28 = vshrl.u32 %v817_v20, %v222_v15  ;;  %v231_v29 = vshrl.u32 %v818_v22, %v222_v15 }
  0x71   : > { %v234_v30 = vshrl.u32 %v819_v24, %v222_v15  ;;  %v237_v32 = vshrl.u32 %v820_v31, %v222_v15  ;;  %vm240_vm3 = vcmp.lt.s32.totalorder %v220_v14, 2  ;;  %vm241_vm4 = vcmp.lt.s32.totalorder %v220_v14, 3 }
  0x72   : > { %v226_v34 = vor.u32 %v225_v27, %v224_v17  ;;  %v229_v35 = vor.u32 %v228_v28, %v227_v19  ;;  %v232_v36 = vor.u32 %v231_v29, %v230_v21 }
  0x73   : > { %v235_v37 = vor.u32 %v234_v30, %v233_v23  ;;  %v238_v38 = vor.u32 %v237_v32, %v236_v25 }
  0x74   : > { %v243_v39 = vsel %vm239_vm1, %v223_v26, %v226_v34  ;;  %v244_v40 = vsel %vm242_vm2, %v232_v36, 2102212464  ;;  %v247_v41 = vsel %vm239_vm1, %v226_v34, %v229_v35  ;;  %v251_v42 = vsel %vm239_vm1, %v229_v35, %v232_v36 }
  0x75   : > { %v245_v43 = vsel %vm241_vm4, %v229_v35, %v244_v40  ;;  %v248_v44 = vsel %vm242_vm2, %v235_v37, 920167782  ;;  %v252_v45 = vsel %vm242_vm2, %v238_v38, 1326507024 }
  0x76   : > { %v249_v46 = vsel %vm241_vm4, %v232_v36, %v248_v44  ;;  %v253_v47 = vsel %vm241_vm4, %v235_v37, %v252_v45  ;;  %v246_v48 = vsel %vm240_vm3, %v243_v39, %v245_v43 }
  0x77   : > { %v250_v49 = vsel %vm240_vm3, %v247_v41, %v249_v46  ;;  %v254_v50 = vsel %vm240_vm3, %v251_v42, %v253_v47  ;;  %v262_v55 = vmul.u32 %v255_v33, %v246_v48 }
  0x78   : > { %v1013_v51 = vmul.u32.u64.low %v255_v33, %v254_v50  ;;  %v1014_v52 = vmul.u32.u64.high %v255_v33, %v254_v50, %v1013_v51  ;;  %v1016_v53 = vmul.u32.u64.low %v255_v33, %v250_v49  ;;  %v1017_v54 = vmul.u32.u64.high %v255_v33, %v250_v49, %v1016_v53 }
  0x7a   : > { %vm264_vm5 = vc.u32 %v1014_v52, %v1016_v53  ;;  %v265_v56 = vadd.s32 1, %v1017_v54  ;;  %v263_v3 = vadd.s32 %v1016_v53, %v1014_v52 }
  0x7c   : > { %v266_v57 = vsel %vm264_vm5, %v265_v56, %v1017_v54 }
  0x7d   : > { %v267_v58 = vadd.s32 %v266_v57, %v262_v55 }
  0x7f   : > { %v268_v59 = vadd.s32 536870912, %v267_v58 }
  0x81   : > { %v269_v60 = vshrl.u32 %v268_v59, 30 }
  0x83   : > { %v270_v61 = vshll.u32 %v269_v60, 30  ;;  %v293_v17 = vsub.s32 4, %v269_v60 }
  0x85   : > { %v271_v62 = vsub.s32 %v267_v58, %v270_v61  ;;  %v294_v20 = vsel %vm209_vm7, %v293_v17, %v269_v60 }
  0x86   : > { %v296_v23 = vsel %vm208_vm8, 0, %v294_v20 }
  0x87   : > { %v273_v63 = vsub.s32 0, %v271_v62  ;;  %v405_v24 = vadd.s32 3, %v296_v23  ;;  %v300_v25 = vand.u32 3, %v296_v23 }
  0x89   : > { %v567_v0 = vmin.u32 %v273_v63, %v271_v62  ;;  %v406_v26 = vand.u32 3, %v405_v24  ;;  %vm305_vm9 = vcmp.eq.s32.totalorder %v300_v25, 2  ;;  %vm302_vm11 = vcmp.eq.s32.totalorder %v300_v25, 0 }
  0x8a   : > { %vm301_vm13 = vcmp.lt.s32.totalorder %v300_v25, 2 }
  0x8b   : > { %v275_v1 = vclz %v567_v0  ;;  %vm411_vm10 = vcmp.eq.s32.totalorder %v406_v26, 2  ;;  %vm408_vm12 = vcmp.eq.s32.totalorder %v406_v26, 0  ;;  %vm407_vm14 = vcmp.lt.s32.totalorder %v406_v26, 2 }
  0x8d   : > { %v568_v2 = vadd.s32 4294967294, %v275_v1 }
  0x8f   : > { %vm569_vm6 = vcmp.lt.s32.totalorder %v568_v2, 0 }
  0x90   : > { %v278_v5 = vsel %vm569_vm6, 0, %v568_v2 }
  0x91   : > { %v279_v6 = vsub.s32 32, %v278_v5  ;;  %v280_v8 = vshll.u32 %v271_v62, %v278_v5  ;;  %v283_v9 = vsub.s32 4294967266, %v278_v5 }
  0x93   : > { %v281_v10 = vshrl.u32 %v263_v3, %v279_v6  ;;  %v284_v11 = vadd.s32 127, %v283_v9 }
  0x95   : > { %v282_v12 = vor.u32 %v281_v10, %v280_v8  ;;  %v285_v13 = vshll.u32 %v284_v11, 23 }
  0x97   : > { %v286_v14 = vor.u32 4788187, %v285_v13  ;;  %v289_v15 = vcvt.s32.f32 %v282_v12 }
  0x99   : > { %v287_v16 = vand.u32 2147483647, %v286_v14 }
  0x9b   : > { %v290_v18 = vmul.f32 %v289_v15, %v287_v16 }
  0x9d   : > { %v291_v19 = vxor.u32 2147483648, %v290_v18 }
  0x9f   : > { %v292_v21 = vsel %vm209_vm7, %v291_v19, %v290_v18 }
  0xa0   : > { %v295_v22 = vsel %vm208_vm8, %v1007_v4, %v292_v21 }
  0xa1   : > { %663 = vcosq.f32 %v295_v22 }
  0xa2   : > { %665 = vsinq.f32 %v295_v22 }
  0xab   : > { %v664_v27 = vpop.eup %663 }
  0xac   : > { %v666_v28 = vpop.eup %665  ;;  %v306_v29 = vxor.u32 2147483648, %v664_v27 }
  0xad   : > { %v303_v7 = vxor.u32 2147483648, %v666_v28 }
  0xae   : > { %v307_v30 = vsel %vm305_vm9, %v306_v29, %v666_v28  ;;  %v413_v31 = vsel %vm411_vm10, %v306_v29, %v666_v28 }
  0xaf   : > { %v304_v32 = vsel %vm302_vm11, %v664_v27, %v303_v7  ;;  %v410_v33 = vsel %vm408_vm12, %v664_v27, %v303_v7 }
  0xb0   : > { %v308_v34 = vsel %vm301_vm13, %v304_v32, %v307_v30  ;;  %v414_v35 = vsel %vm407_vm14, %v410_v33, %v413_v31 }
  0xb1   : > { %v309_v36 = vsel %vm299_vm15, nan, %v308_v34  ;;  %v415_v37 = vsel %vm299_vm15, nan, %v414_v35 }
  0xb2   : > { %311 = vst.msk [vmem:[#allocation2] sm:$0xff] %vm310_vm0, %v309_v36  ;;  %416 = vst.msk [vmem:[#allocation3] sm:$0xff] %vm310_vm0, %v415_v37 }
  0xb3 PF: > { %s821_s17 = smov 16   ;;  %v417_v4 = vld [vmem:[%s998_s8] sm:$0xff]  ;;  %s822_s19 = smov 112   ;;  %vm442_vm1 = vcmask 130048   ;;  %vm444_vm2 = vcmask 261120  }
  0xb4   : > { %s575_s4 = sshll.u32 %s803_s12, 7  ;;  %s461_s5 = sshll.u32 %s1004_s21, 4  ;;  %s1036_s5 = int_to_ptr.vmem [resolvable:$true] %s461_s5 }
  0xb5   : > { %s1034_s16 = scalar_lea.hbm %s1086_s2, %s575_s4  ;;  %s447_s22 = scalar_lea.sflag [#allocation6], %s994_s18 }
  0xb6   : > { %s725_s12 = scalar_lea.vmem %s1036_s5, 128  ;;  %s823_s23 = smov [#allocation9]  }
  0xb7   : > { %p726_p6 = scmp.ne.s32.totalorder %s1036_s5, %s725_s12  ;;  %s729_s28 = sshll.u32 %s823_s23, 4  ;;  %s730_s28 = int_to_ptr.vmem [resolvable:$false] %s729_s28 }
  0xb8   : > { %s731_s27 = scalar_lea.vmem %s730_s28, 256  ;;  %p732_p12 = scmp.lt.s32.totalorder %s1036_s5, %s730_s28 }
  0xb9   : > { %v419_v38 = vld [vmem:[#allocation3] sm:$0xff]  ;;  %v418_v39 = vld [vmem:[#allocation2] sm:$0xff]  ;;  %p727_p8 = pnand %p726_p6, %p940_p13  ;;  %p733_p0 = scmp.lt.s32.totalorder %s731_s27, %s725_s12 }
  0xba   : > { %422 = vrot.lane.b32.xlu0 %v419_v38, %s821_s17  ;;  %v436_v42 = vmul.f32 %v419_v38, %v417_v4  ;;  %v420_v45 = vmul.f32 %v418_v39, %v417_v4 }
  0xbb   : > { %p728_p9 = pneg %p727_p8  ;;  %p734_p5 = por %p733_p0, %p732_p12 }
  0xbd   : > { %p735_p10 = pnand %p734_p5, %p728_p9 }
  0xbe   : > { %432 = vrot.lane.b32.xlu0 %v418_v39, %s821_s17 }
 0x12c   : > { %v423_v40 = vpop.permute.xlu0 %422 }
 0x12d   : > { %v425_v41 = vmul.f32 %v423_v40, %v417_v4 }
 0x12f   : > { %427 = vrot.lane.b32.xlu1 %v425_v41, %s822_s19 }
 0x130   : > { %v433_v43 = vpop.permute.xlu0 %432 }
 0x131   : > { %v435_v46 = vmul.f32 %v433_v43, %v417_v4 }
 0x133   : > { %438 = vrot.lane.b32.xlu1 %v436_v42, %s821_s17 }
 0x1a1   : > { %v428_v44 = vpop.permute.xlu1 %427 }
 0x1a2   : > { %v430_v48 = vsub.f32 %v420_v45, %v428_v44 }
 0x1a5   : > { %v439_v47 = vpop.permute.xlu1 %438 }
 0x1a6   : > { %v441_v49 = vadd.f32 %v439_v47, %v435_v46 }
 0x1a8   : > { %v443_v50 = vsel %vm442_vm1, %v430_v48, %v441_v49 }
 0x1a9   : > { %445 = vst.msk [vmem:[%s1004_s21] sm:$0xff] %vm444_vm2, %v443_v50 }
 0x1aa   : > { %738 = shalt.err (!%p735_p10)
}
 0x1ab   : > { %s739_s30 = scalar_lea.hbm %s1034_s16, 128  ;;  %s743_s7 = scalar_lea.hbm %s1086_s2, 256 }
 0x1ac   : > { %p740_p1 = scmp.ne.s32.totalorder %s1034_s16, %s739_s30  ;;  %p744_p3 = scmp.lt.u32.totalorder %s1034_s16, %s1086_s2 }
 0x1ad   : > { %p745_p11 = scmp.lt.u32.totalorder %s743_s7, %s739_s30  ;;  %p747_p6 = scmp.lt.u32.totalorder %s739_s30, %s1034_s16 }
 0x1ae   : > { %p741_p2 = pnand %p740_p1, %p940_p13 }
 0x1af   : > { %p746_p4 = por %p745_p11, %p744_p3 }
 0x1b0   : > { %p742_p7 = pneg %p741_p2 }
 0x1b1   : > { %p748_p8 = por %p747_p6, %p746_p4 }
 0x1b3   : > { %p749_p9 = pnand %p748_p8, %p742_p7 }
 0x1b5   : > { %752 = shalt.err (!%p749_p9)
}
 0x1b6   : > { %588 = dma.vmem_to_hbm [thread:$0]  (%p940_p13), %s1036_s5, 128, %s1034_s16, %s447_s22  }
 0x1b7 PF: > { %s473_s21 = sand.u32 1, %s791_s9   ;;  %p1105_p12 = scmp.ne.s32.totalorder %s1094_s20, 0 }
 0x1b8   : > { %p1106_p0 = scmp.ge.s32.totalorder %s811_s14, 2  ;;  %s474_s17 = scalar_lea.sflag [#allocation6], %s473_s21 }
 0x1ba   : > { %p599_p5 = pnand %p1106_p0, %p1105_p12 }
 0x1bc   : > { %786 = dma.done.wait (!%p599_p5), %s474_s17, 128  }
 0x1bd   : > { %788 = vsyncadd (!%p599_p5), %s474_s17, 4294967168  ;;  %s19_s14 = sadd.s32 1, %s811_s14   ;;  %s1107_s9 = smov %s795_s10 }
 0x1be   : > { %p16_p10 = scmp.ge.s32.totalorder %s19_s14, 4   ;;  %s1108_s10 = smov %s799_s11 }
 0x1bf   : > { %s1109_s11 = smov %s948_s29  ;;  %s1110_s12 = smov %s807_s13 }
 0x1c0   : > { %s1111_s13 = smov %s1113_s25  ;;  %18 = sbr.rel (!%p16_p10) target bundleno = 7 (0x7), region = 82 }
 0x1c7   :  { %479 = vsyncpa [#allocation5], 1 }
 0x1c8   :  { %481 = vsyncpa [#allocation5 + $0x1], 1 }
 0x1c9   :  { %482 = vsyncpa [#allocation8], 1 }
 0x1ca   :  { %484 = vsyncpa [#allocation8 + $0x1], 1 }
 0x1cb   :  { %485 = vsyncpa [#allocation6], 1 }
 0x1cc   :  { %487 = vsyncpa [#allocation6 + $0x1], 1 }

</bundles_post_ra>
